<compile_context>
chip_gen: v7x
topology: tpu7x:2x2x1
jax: 0.10.0
libtpu: 0.0.40
codegen_flags: <defaults>
</compile_context>

<pallas_src>
import functools

import jax
import jax.numpy as jnp
from jax.experimental import pallas as pl
from jax.experimental.pallas import tpu as pltpu

EPS = 1e-5


# --------------------------------------------------------------------------
# Fused Pallas kernel: conv1 -> bn1 -> relu -> conv2 -> bn2 -> +x -> relu
# --------------------------------------------------------------------------
def _basic_block_kernel(x_ref, mask_ref, w1_ref, w2_ref, bn_ref, o_ref,
                        slab_ref, *, shifts, c_pad, inv_m):
    """All operands are lane-dense (rows = channels, cols = flat pixels).

    x_ref    : (C_pad, L)        channel-major flattened input (L = 128-padded N*H*W)
    mask_ref : (9, L)            per-tap neighbour-validity masks (1.0 = in bounds)
    w1_ref   : (C_pad, 9*C_pad)  conv1 weights, column t*C_pad + ci
    w2_ref   : (C_pad, 9*C_pad)  conv2 weights, same layout
    bn_ref   : (C_pad, 4)        columns = [gamma1, beta1, gamma2, beta2]
    o_ref    : (C_pad, L)        output slab
    slab_ref : (9*C_pad, L)      VMEM scratch: stacked shifted/masked input
    """
    Cp = c_pad
    x = x_ref[...]                                   # (Cp, L), read once

    def stack_taps(src):
        # 9 shifted+masked copies of `src`, packed at sublane offsets t*Cp.
        # Shifts run on the XLU; the mask multiply is one VPU op per tap.
        for t, s in enumerate(shifts):
            shifted = pltpu.roll(src, s, axis=1) if s else src
            slab_ref[t * Cp:(t + 1) * Cp, :] = shifted * mask_ref[t:t + 1, :]

    def bn_scale_shift(acc, gamma, beta):
        # Single-pass batch statistics (biased variance, BN training mode).
        mean = jnp.sum(acc, axis=1, keepdims=True) * inv_m
        var = jnp.sum(acc * acc, axis=1, keepdims=True) * inv_m - mean * mean
        scale = gamma * jax.lax.rsqrt(var + EPS)
        shift = beta - mean * scale
        return scale, shift

    # ---- conv1 as ONE MXU matmul (contraction 9*C_pad) + bn1 + relu --------
    stack_taps(x)
    acc1 = jnp.dot(w1_ref[...], slab_ref[...],
                   preferred_element_type=jnp.float32)
    scale1, shift1 = bn_scale_shift(acc1, bn_ref[:, 0:1], bn_ref[:, 1:2])
    h1 = jnp.maximum(acc1 * scale1 + shift1, 0.0)     # stays in VMEM/vregs

    # ---- conv2 (reuse scratch) + bn2 + residual add + relu -----------------
    stack_taps(h1)
    acc2 = jnp.dot(w2_ref[...], slab_ref[...],
                   preferred_element_type=jnp.float32)
    scale2, shift2 = bn_scale_shift(acc2, bn_ref[:, 2:3], bn_ref[:, 3:4])
    o_ref[...] = jnp.maximum(acc2 * scale2 + shift2 + x, 0.0)


# --------------------------------------------------------------------------
# Wrapper: minimal layout plumbing + pallas_call
# --------------------------------------------------------------------------
def _full_spec(shape):
    # Full-array block (dims equal to the full array dims are always allowed).
    return pl.BlockSpec(shape, lambda i, _r=len(shape): (0,) * _r)


def _stack_conv_weights(w, c_pad):
    # (Cout, Cin, 3, 3) -> (C_pad, 9*C_pad); column index = tap*C_pad + cin.
    c_out, c_in = w.shape[:2]
    taps = jnp.transpose(w, (2, 3, 0, 1)).reshape(9, c_out, c_in)   # [t,co,ci]
    taps = jnp.pad(taps, ((0, 0), (0, c_pad - c_out), (0, c_pad - c_in)))
    return jnp.transpose(taps, (1, 0, 2)).reshape(c_pad, 9 * c_pad)


@jax.jit
def basic_block_forward(x_nchw, w1, g1, b1, w2, g2, b2):
    """BasicBlock forward (stride=1, no downsample), training-mode BatchNorm."""
    N, C, H, W = x_nchw.shape
    L = N * H * W
    L_pad = ((L + 127) // 128) * 128          # lane-dense frame (512 here)
    C_pad = max(8, -(-C // 8) * 8)            # sublane-aligned channel rows

    # channel-major, flattened, channel/lane zero-padded input slab
    x_cm = jnp.transpose(x_nchw, (1, 0, 2, 3)).reshape(C, L)
    x_slab = jnp.pad(x_cm, ((0, C_pad - C), (0, L_pad - L)))        # (C_pad, L_pad)

    # per-tap neighbour-validity masks (reproduce conv zero padding)
    j = jnp.arange(L)
    hh = (j // W) % H
    ww = j % W
    masks, offsets = [], []
    for kh in range(3):
        for kw in range(3):
            dh, dw = kh - 1, kw - 1
            ok = ((hh + dh >= 0) & (hh + dh < H)
                  & (ww + dw >= 0) & (ww + dw < W))
            masks.append(ok)
            offsets.append(dh * W + dw)
    tap_mask = jnp.stack(masks).astype(jnp.float32)                 # (9, L)
    tap_mask = jnp.pad(tap_mask, ((0, 0), (0, L_pad - L)))          # (9, L_pad)
    shifts = tuple((-d) % L_pad for d in offsets)                   # static ints

    w1_stk = _stack_conv_weights(w1, C_pad)                         # (C_pad, 9*C_pad)
    w2_stk = _stack_conv_weights(w2, C_pad)
    bn = jnp.pad(jnp.stack([g1, b1, g2, b2], axis=1),
                 ((0, C_pad - C), (0, 0)))                          # (C_pad, 4)

    kernel = functools.partial(
        _basic_block_kernel, shifts=shifts, c_pad=C_pad, inv_m=float(1.0 / L))

    out_slab = pl.pallas_call(
        kernel,
        out_shape=jax.ShapeDtypeStruct((C_pad, L_pad), jnp.float32),
        grid=(1,),
        in_specs=[_full_spec((C_pad, L_pad)),
                  _full_spec((9, L_pad)),
                  _full_spec((C_pad, 9 * C_pad)),
                  _full_spec((C_pad, 9 * C_pad)),
                  _full_spec((C_pad, 4))],
        out_specs=_full_spec((C_pad, L_pad)),
        scratch_shapes=[pltpu.VMEM((9 * C_pad, L_pad), jnp.float32)],
        compiler_params=pltpu.CompilerParams(
            dimension_semantics=("arbitrary",)),
    )(x_slab, tap_mask, w1_stk, w2_stk, bn)

    out = out_slab[:C, :L].reshape(C, N, H, W)
    return jnp.transpose(out, (1, 0, 2, 3))


# --------------------------------------------------------------------------
# Pure-JAX reference (mirrors the PyTorch module in training mode)
# --------------------------------------------------------------------------
def basic_block_reference(x, w1, g1, b1, w2, g2, b2):
    def conv(x, w):
        return jax.lax.conv_general_dilated(
            x, w, window_strides=(1, 1), padding=((1, 1), (1, 1)),
            dimension_numbers=("NCHW", "OIHW", "NCHW"))

    def bn(y, g, b):
        mean = jnp.mean(y, axis=(0, 2, 3), keepdims=True)
        var = jnp.mean((y - mean) ** 2, axis=(0, 2, 3), keepdims=True)
        return ((y - mean) * jax.lax.rsqrt(var + EPS)
                * g.reshape(1, -1, 1, 1) + b.reshape(1, -1, 1, 1))

    out = jax.nn.relu(bn(conv(x, w1), g1, b1))
    out = bn(conv(out, w2), g2, b2)
    return jax.nn.relu(out + x)


# --------------------------------------------------------------------------
if __name__ == "__main__":
    key = jax.random.PRNGKey(0)
    k_x, k_w1, k_w2, k_g1, k_b1, k_g2, k_b2 = jax.random.split(key, 7)

    N, C, H, W = 2, 4, 16, 16  # in_channels = out_channels = 4, stride = 1
    x = jax.random.normal(k_x, (N, C, H, W), jnp.float32)

    fan_in = C * 3 * 3
    w1 = jax.random.normal(k_w1, (C, C, 3, 3), jnp.float32) * (2.0 / fan_in) ** 0.5
    w2 = jax.random.normal(k_w2, (C, C, 3, 3), jnp.float32) * (2.0 / fan_in) ** 0.5
    g1 = 1.0 + 0.1 * jax.random.normal(k_g1, (C,), jnp.float32)
    b1 = 0.1 * jax.random.normal(k_b1, (C,), jnp.float32)
    g2 = 1.0 + 0.1 * jax.random.normal(k_g2, (C,), jnp.float32)
    b2 = 0.1 * jax.random.normal(k_b2, (C,), jnp.float32)

    out = basic_block_forward(x, w1, g1, b1, w2, g2, b2)
    out = jax.block_until_ready(out)

    ref = basic_block_reference(x, w1, g1, b1, w2, g2, b2)
    assert out.shape == (N, C, H, W) and out.dtype == jnp.float32
    assert jnp.allclose(out, ref, atol=1e-4, rtol=1e-4), \
        f"max err {jnp.max(jnp.abs(out - ref))}"

    print("KERNEL_OK")
</pallas_src>

<mosaic_0001>
module attributes {stable_mosaic.version = 11 : i64} {
  func.func @_basic_block_kernel(%arg0: i32, %arg1: memref<8x512xf32, #tpu.memory_space<vmem>>, %arg2: memref<9x512xf32, #tpu.memory_space<vmem>>, %arg3: memref<8x72xf32, #tpu.memory_space<vmem>>, %arg4: memref<8x72xf32, #tpu.memory_space<vmem>>, %arg5: memref<8x4xf32, #tpu.memory_space<vmem>>, %arg6: memref<8x512xf32, #tpu.memory_space<vmem>>, %arg7: memref<72x512xf32, #tpu.memory_space<vmem>>) attributes {dimension_semantics = [#tpu.dimension_semantics<arbitrary>], iteration_bounds = array<i64: 1>, scalar_prefetch = 0 : i64, scratch_operands = 1 : i64, tpu.core_type = #tpu.core_type<tc>, window_params = [{pipeline_mode = #tpu.pipeline_mode<synchronous>, transform_indices = @transform_0, window_bounds = array<i64: 8, 512>}, {pipeline_mode = #tpu.pipeline_mode<synchronous>, transform_indices = @transform_1, window_bounds = array<i64: 9, 512>}, {pipeline_mode = #tpu.pipeline_mode<synchronous>, transform_indices = @transform_2, window_bounds = array<i64: 8, 72>}, {pipeline_mode = #tpu.pipeline_mode<synchronous>, transform_indices = @transform_3, window_bounds = array<i64: 8, 72>}, {pipeline_mode = #tpu.pipeline_mode<synchronous>, transform_indices = @transform_4, window_bounds = array<i64: 8, 4>}, {pipeline_mode = #tpu.pipeline_mode<synchronous>, transform_indices = @transform_5, window_bounds = array<i64: 8, 512>}]} {
    %c0 = arith.constant 0 : index
    %c0_0 = arith.constant 0 : index
    %0 = vector.load %arg1[%c0, %c0_0] : memref<8x512xf32, #tpu.memory_space<vmem>>, vector<8x512xf32>
    %c17_i32 = arith.constant 17 : i32
    %1 = tpu.dynamic_rotate %0 by %c17_i32 dim 1 : vector<8x512xf32>, i32 -> vector<8x512xf32>
    %c0_1 = arith.constant 0 : index
    %c0_2 = arith.constant 0 : index
    %2 = vector.load %arg2[%c0_1, %c0_2] : memref<9x512xf32, #tpu.memory_space<vmem>>, vector<1x512xf32>
    %3 = vector.broadcast %2 : vector<1x512xf32> to vector<8x512xf32>
    %4 = arith.mulf %1, %3 : vector<8x512xf32>
    %c0_3 = arith.constant 0 : index
    %c0_4 = arith.constant 0 : index
    %5 = vector.load %arg7[%c0_3, %c0_4] : memref<72x512xf32, #tpu.memory_space<vmem>>, vector<8x512xf32>
    tpu.vector_store %arg7[%c0_3, %c0_4], %4 {strides = array<i32>} : memref<72x512xf32, #tpu.memory_space<vmem>>, vector<8x512xf32>,
    %c16_i32 = arith.constant 16 : i32
    %6 = tpu.dynamic_rotate %0 by %c16_i32 dim 1 : vector<8x512xf32>, i32 -> vector<8x512xf32>
    %c1 = arith.constant 1 : index
    %c0_5 = arith.constant 0 : index
    %7 = vector.load %arg2[%c1, %c0_5] : memref<9x512xf32, #tpu.memory_space<vmem>>, vector<1x512xf32>
    %8 = vector.broadcast %7 : vector<1x512xf32> to vector<8x512xf32>
    %9 = arith.mulf %6, %8 : vector<8x512xf32>
    %c8 = arith.constant 8 : index
    %c0_6 = arith.constant 0 : index
    %10 = vector.load %arg7[%c8, %c0_6] : memref<72x512xf32, #tpu.memory_space<vmem>>, vector<8x512xf32>
    tpu.vector_store %arg7[%c8, %c0_6], %9 {strides = array<i32>} : memref<72x512xf32, #tpu.memory_space<vmem>>, vector<8x512xf32>,
    %c15_i32 = arith.constant 15 : i32
    %11 = tpu.dynamic_rotate %0 by %c15_i32 dim 1 : vector<8x512xf32>, i32 -> vector<8x512xf32>
    %c2 = arith.constant 2 : index
    %c0_7 = arith.constant 0 : index
    %12 = vector.load %arg2[%c2, %c0_7] : memref<9x512xf32, #tpu.memory_space<vmem>>, vector<1x512xf32>
    %13 = vector.broadcast %12 : vector<1x512xf32> to vector<8x512xf32>
    %14 = arith.mulf %11, %13 : vector<8x512xf32>
    %c16 = arith.constant 16 : index
    %c0_8 = arith.constant 0 : index
    %15 = vector.load %arg7[%c16, %c0_8] : memref<72x512xf32, #tpu.memory_space<vmem>>, vector<8x512xf32>
    tpu.vector_store %arg7[%c16, %c0_8], %14 {strides = array<i32>} : memref<72x512xf32, #tpu.memory_space<vmem>>, vector<8x512xf32>,
    %c1_i32 = arith.constant 1 : i32
    %16 = tpu.dynamic_rotate %0 by %c1_i32 dim 1 : vector<8x512xf32>, i32 -> vector<8x512xf32>
    %c3 = arith.constant 3 : index
    %c0_9 = arith.constant 0 : index
    %17 = vector.load %arg2[%c3, %c0_9] : memref<9x512xf32, #tpu.memory_space<vmem>>, vector<1x512xf32>
    %18 = vector.broadcast %17 : vector<1x512xf32> to vector<8x512xf32>
    %19 = arith.mulf %16, %18 : vector<8x512xf32>
    %c24 = arith.constant 24 : index
    %c0_10 = arith.constant 0 : index
    %20 = vector.load %arg7[%c24, %c0_10] : memref<72x512xf32, #tpu.memory_space<vmem>>, vector<8x512xf32>
    tpu.vector_store %arg7[%c24, %c0_10], %19 {strides = array<i32>} : memref<72x512xf32, #tpu.memory_space<vmem>>, vector<8x512xf32>,
    %c4 = arith.constant 4 : index
    %c0_11 = arith.constant 0 : index
    %21 = vector.load %arg2[%c4, %c0_11] : memref<9x512xf32, #tpu.memory_space<vmem>>, vector<1x512xf32>
    %22 = vector.broadcast %21 : vector<1x512xf32> to vector<8x512xf32>
    %23 = arith.mulf %0, %22 : vector<8x512xf32>
    %c32 = arith.constant 32 : index
    %c0_12 = arith.constant 0 : index
    %24 = vector.load %arg7[%c32, %c0_12] : memref<72x512xf32, #tpu.memory_space<vmem>>, vector<8x512xf32>
    tpu.vector_store %arg7[%c32, %c0_12], %23 {strides = array<i32>} : memref<72x512xf32, #tpu.memory_space<vmem>>, vector<8x512xf32>,
    %c511_i32 = arith.constant 511 : i32
    %25 = tpu.dynamic_rotate %0 by %c511_i32 dim 1 : vector<8x512xf32>, i32 -> vector<8x512xf32>
    %c5 = arith.constant 5 : index
    %c0_13 = arith.constant 0 : index
    %26 = vector.load %arg2[%c5, %c0_13] : memref<9x512xf32, #tpu.memory_space<vmem>>, vector<1x512xf32>
    %27 = vector.broadcast %26 : vector<1x512xf32> to vector<8x512xf32>
    %28 = arith.mulf %25, %27 : vector<8x512xf32>
    %c40 = arith.constant 40 : index
    %c0_14 = arith.constant 0 : index
    %29 = vector.load %arg7[%c40, %c0_14] : memref<72x512xf32, #tpu.memory_space<vmem>>, vector<8x512xf32>
    tpu.vector_store %arg7[%c40, %c0_14], %28 {strides = array<i32>} : memref<72x512xf32, #tpu.memory_space<vmem>>, vector<8x512xf32>,
    %c497_i32 = arith.constant 497 : i32
    %30 = tpu.dynamic_rotate %0 by %c497_i32 dim 1 : vector<8x512xf32>, i32 -> vector<8x512xf32>
    %c6 = arith.constant 6 : index
    %c0_15 = arith.constant 0 : index
    %31 = vector.load %arg2[%c6, %c0_15] : memref<9x512xf32, #tpu.memory_space<vmem>>, vector<1x512xf32>
    %32 = vector.broadcast %31 : vector<1x512xf32> to vector<8x512xf32>
    %33 = arith.mulf %30, %32 : vector<8x512xf32>
    %c48 = arith.constant 48 : index
    %c0_16 = arith.constant 0 : index
    %34 = vector.load %arg7[%c48, %c0_16] : memref<72x512xf32, #tpu.memory_space<vmem>>, vector<8x512xf32>
    tpu.vector_store %arg7[%c48, %c0_16], %33 {strides = array<i32>} : memref<72x512xf32, #tpu.memory_space<vmem>>, vector<8x512xf32>,
    %c496_i32 = arith.constant 496 : i32
    %35 = tpu.dynamic_rotate %0 by %c496_i32 dim 1 : vector<8x512xf32>, i32 -> vector<8x512xf32>
    %c7 = arith.constant 7 : index
    %c0_17 = arith.constant 0 : index
    %36 = vector.load %arg2[%c7, %c0_17] : memref<9x512xf32, #tpu.memory_space<vmem>>, vector<1x512xf32>
    %37 = vector.broadcast %36 : vector<1x512xf32> to vector<8x512xf32>
    %38 = arith.mulf %35, %37 : vector<8x512xf32>
    %c56 = arith.constant 56 : index
    %c0_18 = arith.constant 0 : index
    %39 = vector.load %arg7[%c56, %c0_18] : memref<72x512xf32, #tpu.memory_space<vmem>>, vector<8x512xf32>
    tpu.vector_store %arg7[%c56, %c0_18], %38 {strides = array<i32>} : memref<72x512xf32, #tpu.memory_space<vmem>>, vector<8x512xf32>,
    %c495_i32 = arith.constant 495 : i32
    %40 = tpu.dynamic_rotate %0 by %c495_i32 dim 1 : vector<8x512xf32>, i32 -> vector<8x512xf32>
    %c8_19 = arith.constant 8 : index
    %c0_20 = arith.constant 0 : index
    %41 = vector.load %arg2[%c8_19, %c0_20] : memref<9x512xf32, #tpu.memory_space<vmem>>, vector<1x512xf32>
    %42 = vector.broadcast %41 : vector<1x512xf32> to vector<8x512xf32>
    %43 = arith.mulf %40, %42 : vector<8x512xf32>
    %c64 = arith.constant 64 : index
    %c0_21 = arith.constant 0 : index
    %44 = vector.load %arg7[%c64, %c0_21] : memref<72x512xf32, #tpu.memory_space<vmem>>, vector<8x512xf32>
    tpu.vector_store %arg7[%c64, %c0_21], %43 {strides = array<i32>} : memref<72x512xf32, #tpu.memory_space<vmem>>, vector<8x512xf32>,
    %c0_22 = arith.constant 0 : index
    %c0_23 = arith.constant 0 : index
    %45 = vector.load %arg3[%c0_22, %c0_23] : memref<8x72xf32, #tpu.memory_space<vmem>>, vector<8x72xf32>
    %c0_24 = arith.constant 0 : index
    %c0_25 = arith.constant 0 : index
    %46 = vector.load %arg7[%c0_24, %c0_25] : memref<72x512xf32, #tpu.memory_space<vmem>>, vector<72x512xf32>
    %cst = arith.constant dense<0.000000e+00> : vector<8x512xf32>
    %47 = tpu.matmul %45, %46, %cst {dimension_numbers = #tpu.dot_dimension_numbers<[1], [0], [0], [1], [0, 0, 1, 1], [], []>} : vector<8x72xf32>, vector<72x512xf32>, vector<8x512xf32> -> vector<8x512xf32>
    %c0_26 = arith.constant 0 : index
    %c0_27 = arith.constant 0 : index
    %48 = vector.load %arg5[%c0_26, %c0_27] : memref<8x4xf32, #tpu.memory_space<vmem>>, vector<8x1xf32>
    %c0_28 = arith.constant 0 : index
    %c1_29 = arith.constant 1 : index
    %49 = vector.load %arg5[%c0_28, %c1_29] : memref<8x4xf32, #tpu.memory_space<vmem>>, vector<8x1xf32>
    %cst_30 = arith.constant dense<0.000000e+00> : vector<8xf32>
    %50 = vector.multi_reduction <add>, %47, %cst_30 [1] : vector<8x512xf32> to vector<8xf32>
    %51 = vector.shape_cast %50 : vector<8xf32> to vector<8x1xf32>
    %cst_31 = arith.constant 0.001953125 : f32
    %52 = vector.broadcast %cst_31 : f32 to vector<8x1xf32>
    %53 = arith.mulf %51, %52 : vector<8x1xf32>
    %54 = arith.mulf %47, %47 : vector<8x512xf32>
    %cst_32 = arith.constant dense<0.000000e+00> : vector<8xf32>
    %55 = vector.multi_reduction <add>, %54, %cst_32 [1] : vector<8x512xf32> to vector<8xf32>
    %56 = vector.shape_cast %55 : vector<8xf32> to vector<8x1xf32>
    %cst_33 = arith.constant 0.001953125 : f32
    %57 = vector.broadcast %cst_33 : f32 to vector<8x1xf32>
    %58 = arith.mulf %56, %57 : vector<8x1xf32>
    %59 = arith.mulf %53, %53 : vector<8x1xf32>
    %60 = arith.subf %58, %59 : vector<8x1xf32>
    %cst_34 = arith.constant 9.99999974E-6 : f32
    %61 = vector.broadcast %cst_34 : f32 to vector<8x1xf32>
    %62 = arith.addf %60, %61 : vector<8x1xf32>
    %63 = math.rsqrt %62 : vector<8x1xf32>
    %64 = arith.mulf %48, %63 : vector<8x1xf32>
    %65 = arith.mulf %53, %64 : vector<8x1xf32>
    %66 = arith.subf %49, %65 : vector<8x1xf32>
    %67 = vector.broadcast %64 : vector<8x1xf32> to vector<8x512xf32>
    %68 = arith.mulf %47, %67 : vector<8x512xf32>
    %69 = vector.broadcast %66 : vector<8x1xf32> to vector<8x512xf32>
    %70 = arith.addf %68, %69 : vector<8x512xf32>
    %cst_35 = arith.constant 0.000000e+00 : f32
    %71 = vector.broadcast %cst_35 : f32 to vector<8x512xf32>
    %72 = arith.maximumf %70, %71 : vector<8x512xf32>
    %c17_i32_36 = arith.constant 17 : i32
    %73 = tpu.dynamic_rotate %72 by %c17_i32_36 dim 1 : vector<8x512xf32>, i32 -> vector<8x512xf32>
    %c0_37 = arith.constant 0 : index
    %c0_38 = arith.constant 0 : index
    %74 = vector.load %arg2[%c0_37, %c0_38] : memref<9x512xf32, #tpu.memory_space<vmem>>, vector<1x512xf32>
    %75 = vector.broadcast %74 : vector<1x512xf32> to vector<8x512xf32>
    %76 = arith.mulf %73, %75 : vector<8x512xf32>
    %c0_39 = arith.constant 0 : index
    %c0_40 = arith.constant 0 : index
    %77 = vector.load %arg7[%c0_39, %c0_40] : memref<72x512xf32, #tpu.memory_space<vmem>>, vector<8x512xf32>
    tpu.vector_store %arg7[%c0_39, %c0_40], %76 {strides = array<i32>} : memref<72x512xf32, #tpu.memory_space<vmem>>, vector<8x512xf32>,
    %c16_i32_41 = arith.constant 16 : i32
    %78 = tpu.dynamic_rotate %72 by %c16_i32_41 dim 1 : vector<8x512xf32>, i32 -> vector<8x512xf32>
    %c1_42 = arith.constant 1 : index
    %c0_43 = arith.constant 0 : index
    %79 = vector.load %arg2[%c1_42, %c0_43] : memref<9x512xf32, #tpu.memory_space<vmem>>, vector<1x512xf32>
    %80 = vector.broadcast %79 : vector<1x512xf32> to vector<8x512xf32>
    %81 = arith.mulf %78, %80 : vector<8x512xf32>
    %c8_44 = arith.constant 8 : index
    %c0_45 = arith.constant 0 : index
    %82 = vector.load %arg7[%c8_44, %c0_45] : memref<72x512xf32, #tpu.memory_space<vmem>>, vector<8x512xf32>
    tpu.vector_store %arg7[%c8_44, %c0_45], %81 {strides = array<i32>} : memref<72x512xf32, #tpu.memory_space<vmem>>, vector<8x512xf32>,
    %c15_i32_46 = arith.constant 15 : i32
    %83 = tpu.dynamic_rotate %72 by %c15_i32_46 dim 1 : vector<8x512xf32>, i32 -> vector<8x512xf32>
    %c2_47 = arith.constant 2 : index
    %c0_48 = arith.constant 0 : index
    %84 = vector.load %arg2[%c2_47, %c0_48] : memref<9x512xf32, #tpu.memory_space<vmem>>, vector<1x512xf32>
    %85 = vector.broadcast %84 : vector<1x512xf32> to vector<8x512xf32>
    %86 = arith.mulf %83, %85 : vector<8x512xf32>
    %c16_49 = arith.constant 16 : index
    %c0_50 = arith.constant 0 : index
    %87 = vector.load %arg7[%c16_49, %c0_50] : memref<72x512xf32, #tpu.memory_space<vmem>>, vector<8x512xf32>
    tpu.vector_store %arg7[%c16_49, %c0_50], %86 {strides = array<i32>} : memref<72x512xf32, #tpu.memory_space<vmem>>, vector<8x512xf32>,
    %c1_i32_51 = arith.constant 1 : i32
    %88 = tpu.dynamic_rotate %72 by %c1_i32_51 dim 1 : vector<8x512xf32>, i32 -> vector<8x512xf32>
    %c3_52 = arith.constant 3 : index
    %c0_53 = arith.constant 0 : index
    %89 = vector.load %arg2[%c3_52, %c0_53] : memref<9x512xf32, #tpu.memory_space<vmem>>, vector<1x512xf32>
    %90 = vector.broadcast %89 : vector<1x512xf32> to vector<8x512xf32>
    %91 = arith.mulf %88, %90 : vector<8x512xf32>
    %c24_54 = arith.constant 24 : index
    %c0_55 = arith.constant 0 : index
    %92 = vector.load %arg7[%c24_54, %c0_55] : memref<72x512xf32, #tpu.memory_space<vmem>>, vector<8x512xf32>
    tpu.vector_store %arg7[%c24_54, %c0_55], %91 {strides = array<i32>} : memref<72x512xf32, #tpu.memory_space<vmem>>, vector<8x512xf32>,
    %c4_56 = arith.constant 4 : index
    %c0_57 = arith.constant 0 : index
    %93 = vector.load %arg2[%c4_56, %c0_57] : memref<9x512xf32, #tpu.memory_space<vmem>>, vector<1x512xf32>
    %94 = vector.broadcast %93 : vector<1x512xf32> to vector<8x512xf32>
    %95 = arith.mulf %72, %94 : vector<8x512xf32>
    %c32_58 = arith.constant 32 : index
    %c0_59 = arith.constant 0 : index
    %96 = vector.load %arg7[%c32_58, %c0_59] : memref<72x512xf32, #tpu.memory_space<vmem>>, vector<8x512xf32>
    tpu.vector_store %arg7[%c32_58, %c0_59], %95 {strides = array<i32>} : memref<72x512xf32, #tpu.memory_space<vmem>>, vector<8x512xf32>,
    %c511_i32_60 = arith.constant 511 : i32
    %97 = tpu.dynamic_rotate %72 by %c511_i32_60 dim 1 : vector<8x512xf32>, i32 -> vector<8x512xf32>
    %c5_61 = arith.constant 5 : index
    %c0_62 = arith.constant 0 : index
    %98 = vector.load %arg2[%c5_61, %c0_62] : memref<9x512xf32, #tpu.memory_space<vmem>>, vector<1x512xf32>
    %99 = vector.broadcast %98 : vector<1x512xf32> to vector<8x512xf32>
    %100 = arith.mulf %97, %99 : vector<8x512xf32>
    %c40_63 = arith.constant 40 : index
    %c0_64 = arith.constant 0 : index
    %101 = vector.load %arg7[%c40_63, %c0_64] : memref<72x512xf32, #tpu.memory_space<vmem>>, vector<8x512xf32>
    tpu.vector_store %arg7[%c40_63, %c0_64], %100 {strides = array<i32>} : memref<72x512xf32, #tpu.memory_space<vmem>>, vector<8x512xf32>,
    %c497_i32_65 = arith.constant 497 : i32
    %102 = tpu.dynamic_rotate %72 by %c497_i32_65 dim 1 : vector<8x512xf32>, i32 -> vector<8x512xf32>
    %c6_66 = arith.constant 6 : index
    %c0_67 = arith.constant 0 : index
    %103 = vector.load %arg2[%c6_66, %c0_67] : memref<9x512xf32, #tpu.memory_space<vmem>>, vector<1x512xf32>
    %104 = vector.broadcast %103 : vector<1x512xf32> to vector<8x512xf32>
    %105 = arith.mulf %102, %104 : vector<8x512xf32>
    %c48_68 = arith.constant 48 : index
    %c0_69 = arith.constant 0 : index
    %106 = vector.load %arg7[%c48_68, %c0_69] : memref<72x512xf32, #tpu.memory_space<vmem>>, vector<8x512xf32>
    tpu.vector_store %arg7[%c48_68, %c0_69], %105 {strides = array<i32>} : memref<72x512xf32, #tpu.memory_space<vmem>>, vector<8x512xf32>,
    %c496_i32_70 = arith.constant 496 : i32
    %107 = tpu.dynamic_rotate %72 by %c496_i32_70 dim 1 : vector<8x512xf32>, i32 -> vector<8x512xf32>
    %c7_71 = arith.constant 7 : index
    %c0_72 = arith.constant 0 : index
    %108 = vector.load %arg2[%c7_71, %c0_72] : memref<9x512xf32, #tpu.memory_space<vmem>>, vector<1x512xf32>
    %109 = vector.broadcast %108 : vector<1x512xf32> to vector<8x512xf32>
    %110 = arith.mulf %107, %109 : vector<8x512xf32>
    %c56_73 = arith.constant 56 : index
    %c0_74 = arith.constant 0 : index
    %111 = vector.load %arg7[%c56_73, %c0_74] : memref<72x512xf32, #tpu.memory_space<vmem>>, vector<8x512xf32>
    tpu.vector_store %arg7[%c56_73, %c0_74], %110 {strides = array<i32>} : memref<72x512xf32, #tpu.memory_space<vmem>>, vector<8x512xf32>,
    %c495_i32_75 = arith.constant 495 : i32
    %112 = tpu.dynamic_rotate %72 by %c495_i32_75 dim 1 : vector<8x512xf32>, i32 -> vector<8x512xf32>
    %c8_76 = arith.constant 8 : index
    %c0_77 = arith.constant 0 : index
    %113 = vector.load %arg2[%c8_76, %c0_77] : memref<9x512xf32, #tpu.memory_space<vmem>>, vector<1x512xf32>
    %114 = vector.broadcast %113 : vector<1x512xf32> to vector<8x512xf32>
    %115 = arith.mulf %112, %114 : vector<8x512xf32>
    %c64_78 = arith.constant 64 : index
    %c0_79 = arith.constant 0 : index
    %116 = vector.load %arg7[%c64_78, %c0_79] : memref<72x512xf32, #tpu.memory_space<vmem>>, vector<8x512xf32>
    tpu.vector_store %arg7[%c64_78, %c0_79], %115 {strides = array<i32>} : memref<72x512xf32, #tpu.memory_space<vmem>>, vector<8x512xf32>,
    %c0_80 = arith.constant 0 : index
    %c0_81 = arith.constant 0 : index
    %117 = vector.load %arg4[%c0_80, %c0_81] : memref<8x72xf32, #tpu.memory_space<vmem>>, vector<8x72xf32>
    %c0_82 = arith.constant 0 : index
    %c0_83 = arith.constant 0 : index
    %118 = vector.load %arg7[%c0_82, %c0_83] : memref<72x512xf32, #tpu.memory_space<vmem>>, vector<72x512xf32>
    %cst_84 = arith.constant dense<0.000000e+00> : vector<8x512xf32>
    %119 = tpu.matmul %117, %118, %cst_84 {dimension_numbers = #tpu.dot_dimension_numbers<[1], [0], [0], [1], [0, 0, 1, 1], [], []>} : vector<8x72xf32>, vector<72x512xf32>, vector<8x512xf32> -> vector<8x512xf32>
    %c0_85 = arith.constant 0 : index
    %c2_86 = arith.constant 2 : index
    %120 = vector.load %arg5[%c0_85, %c2_86] : memref<8x4xf32, #tpu.memory_space<vmem>>, vector<8x1xf32>
    %c0_87 = arith.constant 0 : index
    %c3_88 = arith.constant 3 : index
    %121 = vector.load %arg5[%c0_87, %c3_88] : memref<8x4xf32, #tpu.memory_space<vmem>>, vector<8x1xf32>
    %cst_89 = arith.constant dense<0.000000e+00> : vector<8xf32>
    %122 = vector.multi_reduction <add>, %119, %cst_89 [1] : vector<8x512xf32> to vector<8xf32>
    %123 = vector.shape_cast %122 : vector<8xf32> to vector<8x1xf32>
    %cst_90 = arith.constant 0.001953125 : f32
    %124 = vector.broadcast %cst_90 : f32 to vector<8x1xf32>
    %125 = arith.mulf %123, %124 : vector<8x1xf32>
    %126 = arith.mulf %119, %119 : vector<8x512xf32>
    %cst_91 = arith.constant dense<0.000000e+00> : vector<8xf32>
    %127 = vector.multi_reduction <add>, %126, %cst_91 [1] : vector<8x512xf32> to vector<8xf32>
    %128 = vector.shape_cast %127 : vector<8xf32> to vector<8x1xf32>
    %cst_92 = arith.constant 0.001953125 : f32
    %129 = vector.broadcast %cst_92 : f32 to vector<8x1xf32>
    %130 = arith.mulf %128, %129 : vector<8x1xf32>
    %131 = arith.mulf %125, %125 : vector<8x1xf32>
    %132 = arith.subf %130, %131 : vector<8x1xf32>
    %cst_93 = arith.constant 9.99999974E-6 : f32
    %133 = vector.broadcast %cst_93 : f32 to vector<8x1xf32>
    %134 = arith.addf %132, %133 : vector<8x1xf32>
    %135 = math.rsqrt %134 : vector<8x1xf32>
    %136 = arith.mulf %120, %135 : vector<8x1xf32>
    %137 = arith.mulf %125, %136 : vector<8x1xf32>
    %138 = arith.subf %121, %137 : vector<8x1xf32>
    %139 = vector.broadcast %136 : vector<8x1xf32> to vector<8x512xf32>
    %140 = arith.mulf %119, %139 : vector<8x512xf32>
    %141 = vector.broadcast %138 : vector<8x1xf32> to vector<8x512xf32>
    %142 = arith.addf %140, %141 : vector<8x512xf32>
    %143 = arith.addf %142, %0 : vector<8x512xf32>
    %cst_94 = arith.constant 0.000000e+00 : f32
    %144 = vector.broadcast %cst_94 : f32 to vector<8x512xf32>
    %145 = arith.maximumf %143, %144 : vector<8x512xf32>
    %c0_95 = arith.constant 0 : index
    %c0_96 = arith.constant 0 : index
    %146 = vector.load %arg6[%c0_95, %c0_96] : memref<8x512xf32, #tpu.memory_space<vmem>>, vector<8x512xf32>
    tpu.vector_store %arg6[%c0_95, %c0_96], %145 {strides = array<i32>} : memref<8x512xf32, #tpu.memory_space<vmem>>, vector<8x512xf32>,
    return
  }
  func.func @transform_0(%arg0: i32) -> (i32, i32) {
    %c0_i32 = arith.constant 0 : i32
    %c0_i32_0 = arith.constant 0 : i32
    %c0_i32_1 = arith.constant 0 : i32
    return %c0_i32, %c0_i32_0 : i32, i32
  }
  func.func @transform_1(%arg0: i32) -> (i32, i32) {
    %c0_i32 = arith.constant 0 : i32
    %c0_i32_0 = arith.constant 0 : i32
    %c0_i32_1 = arith.constant 0 : i32
    return %c0_i32, %c0_i32_0 : i32, i32
  }
  func.func @transform_2(%arg0: i32) -> (i32, i32) {
    %c0_i32 = arith.constant 0 : i32
    %c0_i32_0 = arith.constant 0 : i32
    %c0_i32_1 = arith.constant 0 : i32
    return %c0_i32, %c0_i32_0 : i32, i32
  }
  func.func @transform_3(%arg0: i32) -> (i32, i32) {
    %c0_i32 = arith.constant 0 : i32
    %c0_i32_0 = arith.constant 0 : i32
    %c0_i32_1 = arith.constant 0 : i32
    return %c0_i32, %c0_i32_0 : i32, i32
  }
  func.func @transform_4(%arg0: i32) -> (i32, i32) {
    %c0_i32 = arith.constant 0 : i32
    %c0_i32_0 = arith.constant 0 : i32
    %c0_i32_1 = arith.constant 0 : i32
    return %c0_i32, %c0_i32_0 : i32, i32
  }
  func.func @transform_5(%arg0: i32) -> (i32, i32) {
    %c0_i32 = arith.constant 0 : i32
    %c0_i32_0 = arith.constant 0 : i32
    %c0_i32_1 = arith.constant 0 : i32
    return %c0_i32, %c0_i32_0 : i32, i32
  }
}

</mosaic_0001>

<bundles_post_ra>
// kernel: basic_block_forward.1
= control target key start
LH: loop header
LB: loop body
LE: loop exit
PB: predicated region body
PF: predicated region fallthrough
CT: control target
= control target key end

     0   :  { %s1360_s20 = smov 16   ;;  %s1361_s21 = smov 17   ;;  %v1367_v4 = vmov 0.0   ;;  %v32_v5 = vlaneseq  ;;  %vm445_vm8 = vcmask 588800   ;;  %s1888_s0 = inlined_call_operand.vmem [shape: f32[8,512], index: 0, kind: input, shape index: {}]   ;;  %s1889_s1 = inlined_call_operand.vmem [shape: f32[9,512], index: 1, kind: input, shape index: {}]   ;;  %s1890_s2 = inlined_call_operand.vmem [shape: f32[8,72], index: 2, kind: input, shape index: {}]   ;;  %s1891_s4 = inlined_call_operand.vmem [shape: f32[8,4], index: 4, kind: input, shape index: {}]   ;;  %s1892_s3 = inlined_call_operand.vmem [shape: f32[8,72], index: 3, kind: input, shape index: {}]   ;;  %s1893_s5 = inlined_call_operand.vmem [shape: f32[8,512], index: 5, kind: output, shape index: {}]  }
   0x1   :  { %v1406_v0 = vld [vmem:[%s1888_s0] sm:$0xff]  ;;  %v1415_v1 = vld [vmem:[%s1888_s0 + $0x8] sm:$0xff]  ;;  %v1424_v2 = vld [vmem:[%s1888_s0 + $0x18] sm:$0xff]  ;;  %s1362_s28 = smov 15   ;;  %s1363_s29 = smov 1   ;;  %513 = vmatprep.mubr.f32.mxu0 %v1367_v4  ;;  %584 = vmatprep.mubr.f32.mxu1 %v1367_v4 }
   0x2   :  { %69 = vrot.lane.b32.xlu1 %v1406_v0, %s1360_s20  ;;  %24 = vrot.lane.b32.xlu0 %v1406_v0, %s1361_s21  ;;  %v1433_v3 = vld [vmem:[%s1888_s0 + $0x10] sm:$0xff]  ;;  %s1364_s30 = smov 127   ;;  %s1365_s6 = smov 113   ;;  %v42_v6 = vshrl.u32 %v32_v5, 7  ;;  %v1489_v7 = vand.u32 127, %v32_v5 }
   0x3   :  { %s1366_s7 = smov 112   ;;  %s1368_s8 = smov 111   ;;  %v1251_v9 = vld [vmem:[%s1889_s1 + $0x1] ss:$8 sm:$0xf] }
   0x4   :  { %v1491_v8 = vsub.s32 1, %v42_v6  ;;  %v39_v10 = vld [vmem:[%s1889_s1] ss:$8 sm:$0xf]  ;;  %v1499_v13 = vsub.s32 0, %v42_v6  ;;  %vm77_vm0 = vcmp.lt.s32.totalorder %v1489_v7, 16 }
   0x5   :  { %vm34_vm1 = vcmp.lt.s32.totalorder %v1489_v7, 17  ;;  %v1505_v18 = vsub.s32 2, %v42_v6  ;;  %v1507_v19 = vsub.s32 3, %v42_v6  ;;  %v1252_v48 = vld [vmem:[%s1889_s1 + $0x2] ss:$8 sm:$0xf] }
   0x6   :  { %71 = vrot.lane.b32.xlu1 %v1415_v1, %s1360_s20  ;;  %26 = vrot.lane.b32.xlu0 %v1415_v1, %s1361_s21  ;;  %v48_v14 = vrot.slane %v39_v10, %v1491_v8  ;;  %v92_v15 = vrot.slane %v1251_v9, %v1491_v8  ;;  %v88_v22 = vrot.slane %v1251_v9, %v1499_v13  ;;  %v1253_v49 = vld [vmem:[%s1889_s1 + $0x3] ss:$8 sm:$0xf]  ;;  %vm121_vm2 = vcmp.lt.s32.totalorder %v1489_v7, 15 }
   0x7   :  { %v44_v23 = vrot.slane %v39_v10, %v1499_v13  ;;  %v96_v31 = vrot.slane %v1251_v9, %v1505_v18  ;;  %v52_v32 = vrot.slane %v39_v10, %v1505_v18  ;;  %v56_v35 = vrot.slane %v39_v10, %v1507_v19  ;;  %v1254_v10 = vld [vmem:[%s1889_s1 + $0x4] ss:$8 sm:$0xf] }
   0x8   :  { %v100_v36 = vrot.slane %v1251_v9, %v1507_v19  ;;  %v136_v54 = vrot.slane %v1252_v48, %v1491_v8  ;;  %vm165_vm3 = vcmp.lt.s32.totalorder %v1489_v7, 1  ;;  %v180_v55 = vrot.slane %v1253_v49, %v1491_v8 }
   0x9   :  { %v176_v62 = vrot.slane %v1253_v49, %v1499_v13  ;;  %v132_v63 = vrot.slane %v1252_v48, %v1499_v13  ;;  %vm240_vm4 = vcmp.lt.s32.totalorder %v1489_v7, 127  ;;  %vm284_vm5 = vcmp.lt.s32.totalorder %v1489_v7, 113 }
   0xa   :  { %75 = vrot.lane.b32.xlu1 %v1424_v2, %s1360_s20  ;;  %30 = vrot.lane.b32.xlu0 %v1424_v2, %s1361_s21  ;;  %vm328_vm6 = vcmp.lt.s32.totalorder %v1489_v7, 112  ;;  %vm372_vm7 = vcmp.lt.s32.totalorder %v1489_v7, 111 }
   0xe   :  { %73 = vrot.lane.b32.xlu1 %v1433_v3, %s1360_s20  ;;  %28 = vrot.lane.b32.xlu0 %v1433_v3, %s1361_s21 }
  0x12   :  { %115 = vrot.lane.b32.xlu1 %v1415_v1, %s1362_s28  ;;  %113 = vrot.lane.b32.xlu0 %v1406_v0, %s1362_s28 }
  0x16   :  { %159 = vrot.lane.b32.xlu1 %v1415_v1, %s1363_s29  ;;  %157 = vrot.lane.b32.xlu0 %v1406_v0, %s1363_s29 }
  0x1a   :  { %163 = vrot.lane.b32.xlu1 %v1424_v2, %s1363_s29  ;;  %119 = vrot.lane.b32.xlu0 %v1424_v2, %s1362_s28 }
  0x1e   :  { %161 = vrot.lane.b32.xlu1 %v1433_v3, %s1363_s29  ;;  %117 = vrot.lane.b32.xlu0 %v1433_v3, %s1362_s28 }
  0x22   :  { %236 = vrot.lane.b32.xlu1 %v1433_v3, %s1364_s30  ;;  %234 = vrot.lane.b32.xlu0 %v1415_v1, %s1364_s30 }
  0x26   :  { %238 = vrot.lane.b32.xlu1 %v1424_v2, %s1364_s30  ;;  %232 = vrot.lane.b32.xlu0 %v1406_v0, %s1364_s30 }
  0x2a   :  { %280 = vrot.lane.b32.xlu1 %v1433_v3, %s1365_s6  ;;  %278 = vrot.lane.b32.xlu0 %v1415_v1, %s1365_s6 }
  0x2e   :  { %324 = vrot.lane.b32.xlu1 %v1433_v3, %s1366_s7  ;;  %322 = vrot.lane.b32.xlu0 %v1415_v1, %s1366_s7 }
  0x32   :  { %320 = vrot.lane.b32.xlu1 %v1406_v0, %s1366_s7  ;;  %276 = vrot.lane.b32.xlu0 %v1406_v0, %s1365_s6 }
  0x36   :  { %326 = vrot.lane.b32.xlu1 %v1424_v2, %s1366_s7  ;;  %282 = vrot.lane.b32.xlu0 %v1424_v2, %s1365_s6 }
  0x3a   :  { %368 = vrot.lane.b32.xlu1 %v1433_v3, %s1368_s8  ;;  %366 = vrot.lane.b32.xlu0 %v1415_v1, %s1368_s8 }
  0x3e   :  { %370 = vrot.lane.b32.xlu1 %v1424_v2, %s1368_s8  ;;  %364 = vrot.lane.b32.xlu0 %v1406_v0, %s1368_s8 }
  0x74   :  { %v70_v11 = vpop.permute.xlu1 %69  ;;  %v25_v12 = vpop.permute.xlu0 %24 }
  0x78   :  { %v72_v16 = vpop.permute.xlu1 %71  ;;  %v27_v17 = vpop.permute.xlu0 %26 }
  0x79   :  { %v80_v20 = vsel %vm77_vm0, %v70_v11, %v72_v16  ;;  %v37_v21 = vsel %vm34_vm1, %v25_v12, %v27_v17 }
  0x7a   :  { %v62_v24 = vmul.f32 %v48_v14, %v37_v21  ;;  %v106_v25 = vmul.f32 %v92_v15, %v80_v20  ;;  %v184_v14 = vrot.slane %v1253_v49, %v1505_v18  ;;  %v188_v15 = vrot.slane %v1253_v49, %v1507_v19 }
  0x7b   :  { %v140_v21 = vrot.slane %v1252_v48, %v1505_v18 }
  0x7c   :  { %v76_v26 = vpop.permute.xlu1 %75  ;;  %v31_v27 = vpop.permute.xlu0 %30  ;;  %v1271_v28 = vpack.c.bf16 %v106_v25, %v62_v24 }
  0x7d   :  { %v81_v29 = vsel %vm77_vm0, %v76_v26, %v70_v11  ;;  %v38_v30 = vsel %vm34_vm1, %v31_v27, %v25_v12 }
  0x7e   :  { %v105_v33 = vmul.f32 %v88_v22, %v81_v29  ;;  %v61_v34 = vmul.f32 %v44_v23, %v38_v30  ;;  %1272 = vmatprep.subr.bf16.mxu0 %v1271_v28  ;;  %v144_v22 = vrot.slane %v1252_v48, %v1507_v19  ;;  %v211_v23 = vrot.slane %v1254_v10, %v1491_v8 }
  0x80   :  { %v74_v37 = vpop.permute.xlu1 %73  ;;  %v29_v38 = vpop.permute.xlu0 %28  ;;  %v1273_v39 = vpack.c.bf16 %v105_v33, %v61_v34 }
  0x81   :  { %v78_v40 = vsel %vm77_vm0, %v74_v37, %v76_v26  ;;  %v79_v41 = vsel %vm77_vm0, %v72_v16, %v74_v37  ;;  %v35_v42 = vsel %vm34_vm1, %v29_v38, %v31_v27  ;;  %v36_v43 = vsel %vm34_vm1, %v27_v17, %v29_v38  ;;  %v1255_v16 = vld [vmem:[%s1889_s1 + $0x5] ss:$8 sm:$0xf] }
  0x82   :  { %v107_v44 = vmul.f32 %v96_v31, %v79_v41  ;;  %v63_v45 = vmul.f32 %v52_v32, %v36_v43  ;;  %1274 = vmatpush1.bf16.msra.mxu0 %v1273_v39  ;;  %v64_v46 = vmul.f32 %v56_v35, %v35_v42  ;;  %v108_v47 = vmul.f32 %v100_v36, %v78_v40 }
  0x83   :  { %v255_v27 = vrot.slane %v1255_v16, %v1491_v8  ;;  %v225_v36 = vmul.f32 %v211_v23, %v1415_v1  ;;  %v207_v37 = vrot.slane %v1254_v10, %v1499_v13  ;;  %v219_v42 = vrot.slane %v1254_v10, %v1507_v19 }
  0x84   :  { %v116_v50 = vpop.permute.xlu1 %115  ;;  %v114_v51 = vpop.permute.xlu0 %113  ;;  %v1287_v52 = vpack.c.bf16 %v108_v47, %v64_v46  ;;  %v1289_v53 = vpack.c.bf16 %v107_v44, %v63_v45  ;;  %v215_v43 = vrot.slane %v1254_v10, %v1505_v18  ;;  %v259_v46 = vrot.slane %v1255_v16, %v1505_v18 }
  0x85   :  { %v124_v56 = vsel %vm121_vm2, %v114_v51, %v116_v50  ;;  %v251_v47 = vrot.slane %v1255_v16, %v1499_v13  ;;  %v263_v1 = vrot.slane %v1255_v16, %v1507_v19 }
  0x86   :  { %1288 = vmatprep.subr.bf16.mxu1 %v1287_v52  ;;  %v150_v60 = vmul.f32 %v136_v54, %v124_v56  ;;  %v227_v52 = vmul.f32 %v219_v42, %v1424_v2  ;;  %v1257_v2 = vld [vmem:[%s1889_s1 + $0x7] ss:$8 sm:$0xf] }
  0x87   :  { %1290 = vmatpush1.bf16.msra.mxu1 %v1289_v53  ;;  %v226_v53 = vmul.f32 %v215_v43, %v1433_v3  ;;  %v339_v16 = vrot.slane %v1257_v2, %v1499_v13 }
  0x88   :  { %v160_v57 = vpop.permute.xlu1 %159  ;;  %v158_v58 = vpop.permute.xlu0 %157 }
  0x89   :  { %v168_v59 = vsel %vm165_vm3, %v158_v58, %v160_v57 }
  0x8a   :  { %v194_v61 = vmul.f32 %v180_v55, %v168_v59 }
  0x8c   :  { %v164_v5 = vpop.permute.xlu1 %163  ;;  %v120_v6 = vpop.permute.xlu0 %119  ;;  %v1275_v9 = vpack.c.bf16 %v194_v61, %v150_v60 }
  0x8d   :  { %v169_v11 = vsel %vm165_vm3, %v164_v5, %v158_v58  ;;  %v125_v12 = vsel %vm121_vm2, %v120_v6, %v114_v51  ;;  %v224_v51 = vmul.f32 %v207_v37, %v1406_v0  ;;  %v1256_v0 = vld [vmem:[%s1889_s1 + $0x6] ss:$8 sm:$0xf] }
  0x8e   :  { %v193_v17 = vmul.f32 %v176_v62, %v169_v11  ;;  %v149_v20 = vmul.f32 %v132_v63, %v125_v12  ;;  %1276 = vmatprep.subr.bf16.mxu0 %v1275_v9 }
  0x90   :  { %v162_v24 = vpop.permute.xlu1 %161  ;;  %v118_v25 = vpop.permute.xlu0 %117  ;;  %v1277_v26 = vpack.c.bf16 %v193_v17, %v149_v20  ;;  %v295_v17 = vrot.slane %v1256_v0, %v1499_v13 }
  0x91   :  { %v166_v28 = vsel %vm165_vm3, %v162_v24, %v164_v5  ;;  %v167_v29 = vsel %vm165_vm3, %v160_v57, %v162_v24  ;;  %v122_v30 = vsel %vm121_vm2, %v118_v25, %v120_v6  ;;  %v123_v31 = vsel %vm121_vm2, %v116_v50, %v118_v25 }
  0x92   :  { %v195_v32 = vmul.f32 %v184_v14, %v167_v29  ;;  %v196_v33 = vmul.f32 %v188_v15, %v166_v28  ;;  %v151_v34 = vmul.f32 %v140_v21, %v123_v31  ;;  %v152_v35 = vmul.f32 %v144_v22, %v122_v30  ;;  %1278 = vmatpush1.bf16.msra.mxu0 %v1277_v26 }
  0x93   :  { %v299_v5 = vrot.slane %v1256_v0, %v1491_v8  ;;  %v343_v6 = vrot.slane %v1257_v2, %v1491_v8  ;;  %v347_v25 = vrot.slane %v1257_v2, %v1505_v18  ;;  %v351_v26 = vrot.slane %v1257_v2, %v1507_v19 }
  0x94   :  { %v237_v38 = vpop.permute.xlu1 %236  ;;  %v235_v39 = vpop.permute.xlu0 %234  ;;  %v1291_v40 = vpack.c.bf16 %v196_v33, %v152_v35  ;;  %v1293_v41 = vpack.c.bf16 %v195_v32, %v151_v34  ;;  %v303_v30 = vrot.slane %v1256_v0, %v1505_v18  ;;  %v307_v31 = vrot.slane %v1256_v0, %v1507_v19  ;;  %v408_v0 = vld [vmem:[%s1890_s2] sm:$0xff] }
  0x95   :  { %v242_v44 = vsel %vm240_vm4, %v235_v39, %v237_v38 }
  0x96   :  { %v269_v45 = vmul.f32 %v255_v27, %v242_v44  ;;  %1292 = vmatprep.subr.bf16.mxu1 %v1291_v40  ;;  %v1258_v27 = vld [vmem:[%s1889_s1 + $0x20] ss:$8 sm:$0xf] }
  0x97   :  { %1294 = vmatpush1.bf16.msra.mxu1 %v1293_v41  ;;  %v387_v35 = vrot.slane %v1258_v27, %v1491_v8 }
  0x98   :  { %v239_v48 = vpop.permute.xlu1 %238  ;;  %v233_v49 = vpop.permute.xlu0 %232  ;;  %v1279_v50 = vpack.c.bf16 %v269_v45, %v225_v36 }
  0x99   :  { %v241_v54 = vsel %vm240_vm4, %v237_v38, %v239_v48  ;;  %v243_v55 = vsel %vm240_vm4, %v233_v49, %v235_v39  ;;  %v244_v56 = vsel %vm240_vm4, %v239_v48, %v233_v49  ;;  %v391_v49 = vrot.slane %v1258_v27, %v1505_v18 }
  0x9a   :  { %v270_v57 = vmul.f32 %v259_v46, %v241_v54  ;;  %v268_v58 = vmul.f32 %v251_v47, %v243_v55  ;;  %v271_v59 = vmul.f32 %v263_v1, %v244_v56  ;;  %1280 = vmatprep.subr.bf16.mxu0 %v1279_v50  ;;  %v383_v50 = vrot.slane %v1258_v27, %v1499_v13 }
  0x9c   :  { %v281_v3 = vpop.permute.xlu1 %280  ;;  %v279_v60 = vpop.permute.xlu0 %278  ;;  %v1281_v61 = vpack.c.bf16 %v268_v58, %v224_v51  ;;  %v1295_v62 = vpack.c.bf16 %v271_v59, %v227_v52  ;;  %v1297_v63 = vpack.c.bf16 %v270_v57, %v226_v53  ;;  %v395_v51 = vrot.slane %v1258_v27, %v1507_v19 }
  0x9d   :  { %v286_v9 = vsel %vm284_vm5, %v279_v60, %v281_v3 }
  0x9e   :  { %1282 = vmatpush1.bf16.msra.mxu0 %v1281_v61  ;;  %1296 = vmatprep.subr.bf16.mxu1 %v1295_v62  ;;  %v313_v14 = vmul.f32 %v299_v5, %v286_v9 }
  0x9f   :  { %1298 = vmatpush1.bf16.msra.mxu1 %v1297_v63 }
  0xa0   :  { %v325_v10 = vpop.permute.xlu1 %324  ;;  %v323_v11 = vpop.permute.xlu0 %322 }
  0xa1   :  { %v330_v12 = vsel %vm328_vm6, %v323_v11, %v325_v10 }
  0xa2   :  { %v357_v15 = vmul.f32 %v343_v6, %v330_v12 }
  0xa4   :  { %v321_v20 = vpop.permute.xlu1 %320  ;;  %v277_v21 = vpop.permute.xlu0 %276  ;;  %v1283_v22 = vpack.c.bf16 %v357_v15, %v313_v14 }
  0xa5   :  { %v331_v23 = vsel %vm328_vm6, %v321_v20, %v323_v11  ;;  %v287_v24 = vsel %vm284_vm5, %v277_v21, %v279_v60 }
  0xa6   :  { %v356_v28 = vmul.f32 %v339_v16, %v331_v23  ;;  %v312_v29 = vmul.f32 %v295_v17, %v287_v24  ;;  %1284 = vmatprep.subr.bf16.mxu0 %v1283_v22  ;;  %v1369_v16 = vmov 0  }
  0xa7   :  { %1348 = vset.pattern.permute.xlu1 %v1369_v16 }
  0xa8   :  { %v327_v32 = vpop.permute.xlu1 %326  ;;  %v283_v33 = vpop.permute.xlu0 %282  ;;  %v1285_v34 = vpack.c.bf16 %v356_v28, %v312_v29 }
  0xa9   :  { %v329_v36 = vsel %vm328_vm6, %v325_v10, %v327_v32  ;;  %v332_v37 = vsel %vm328_vm6, %v327_v32, %v321_v20  ;;  %v285_v38 = vsel %vm284_vm5, %v281_v3, %v283_v33  ;;  %v288_v39 = vsel %vm284_vm5, %v283_v33, %v277_v21 }
  0xaa   :  { %v358_v40 = vmul.f32 %v347_v25, %v329_v36  ;;  %v359_v41 = vmul.f32 %v351_v26, %v332_v37  ;;  %v314_v42 = vmul.f32 %v303_v30, %v285_v38  ;;  %v315_v43 = vmul.f32 %v307_v31, %v288_v39  ;;  %1286 = vmatpush1.bf16.msra.mxu0 %v1285_v34  ;;  %v1648_v26 = vld [vmem:[%s1891_s4] sm:$0xff] }
  0xab   :  { %v1370_v25 = vmov 1  }
  0xac   :  { %v369_v44 = vpop.permute.xlu1 %368  ;;  %v367_v45 = vpop.permute.xlu0 %366  ;;  %v1299_v46 = vpack.c.bf16 %v359_v41, %v315_v43  ;;  %v1301_v47 = vpack.c.bf16 %v358_v40, %v314_v42  ;;  %1349 = vset.pattern.permute.xlu0 %v1370_v25  ;;  %v1262_v25 = vld [vmem:[%s1889_s1 + $0x2] ss:$8 sm:$0xf] }
  0xad   :  { %v374_v1 = vsel %vm372_vm7, %v367_v45, %v369_v44 }
  0xae   :  { %v401_v48 = vmul.f32 %v387_v35, %v374_v1  ;;  %1300 = vmatprep.subr.bf16.mxu1 %v1299_v46  ;;  %v653_v1 = vld [vmem:[%s1889_s1] ss:$8 sm:$0xf] }
  0xaf   :  { %1302 = vmatpush1.bf16.msra.mxu1 %v1301_v47 }
  0xb0   :  { %v371_v52 = vpop.permute.xlu1 %370  ;;  %v365_v53 = vpop.permute.xlu0 %364  ;;  %465 = vmatprep.subr.mxu0 %v401_v48  ;;  %v1261_v48 = vld [vmem:[%s1889_s1 + $0x1] ss:$8 sm:$0xf] }
  0xb1   :  { %v373_v54 = vsel %vm372_vm7, %v369_v44, %v371_v52  ;;  %v375_v55 = vsel %vm372_vm7, %v365_v53, %v367_v45  ;;  %v376_v56 = vsel %vm372_vm7, %v371_v52, %v365_v53  ;;  %v704_v52 = vrot.slane %v1261_v48, %v1491_v8 }
  0xb2   :  { %v402_v57 = vmul.f32 %v391_v49, %v373_v54  ;;  %v400_v58 = vmul.f32 %v383_v50, %v375_v55  ;;  %v403_v59 = vmul.f32 %v395_v51, %v376_v56  ;;  %v662_v51 = vrot.slane %v653_v1, %v1491_v8 }
  0xb4   :  { %466 = vmatpush1.msra.mxu0 %v400_v58  ;;  %536 = vmatprep.subr.mxu1 %v403_v59 }
  0xb5   :  { %1259 = vmatmul.mubr.msk.f32.vlgmr.msra.gmra.mrb[0].mxu0 %vm445_vm8, %v408_v0  ;;  %537 = vmatpush1.msra.mxu1 %v402_v57  ;;  %v658_v57 = vrot.slane %v653_v1, %v1499_v13 }
  0xb6   :  { %1260 = vmatmul.mubr.msk.f32.vlgmr.msra.gmra.mrb[0].mxu1 %vm445_vm8, %v408_v0  ;;  %1111 = vmatprep.mubr.f32.mxu0 %v1367_v4  ;;  %v700_v0 = vrot.slane %v1261_v48, %v1499_v13 }
  0xb7   :  { %1182 = vmatprep.mubr.f32.mxu1 %v1367_v4 }
 0x188   :  { %v515_v2 = vpop.f32.mrb[0].mxu0 }
 0x189   :  { %v598_v3 = vmul.f32 %v515_v2, %v515_v2  ;;  %v517_v60 = vpop.f32.mrb[1].mxu0  ;;  %v586_v61 = vpop.f32.mrb[0].mxu1 }
 0x18a   :  { %v592_v62 = vadd.f32 %v517_v60, %v515_v2  ;;  %v599_v63 = vmul.f32 %v517_v60, %v517_v60  ;;  %v600_v5 = vmul.f32 %v586_v61, %v586_v61  ;;  %v588_v6 = vpop.f32.mrb[1].mxu1 }
 0x18b   :  { %v601_v12 = vmul.f32 %v588_v6, %v588_v6 }
 0x18c   :  { %v593_v9 = vadd.f32 %v592_v62, %v586_v61  ;;  %v602_v10 = vadd.f32 %v599_v63, %v598_v3  ;;  %v666_v62 = vrot.slane %v653_v1, %v1505_v18  ;;  %v670_v63 = vrot.slane %v653_v1, %v1507_v19 }
 0x18e   :  { %v594_v11 = vadd.f32 %v593_v9, %v588_v6  ;;  %v603_v14 = vadd.f32 %v602_v10, %v600_v5  ;;  %v708_v10 = vrot.slane %v1261_v48, %v1505_v18 }
 0x190   :  { %595 = vadd.xlane.f32.xlu0 %v594_v11  ;;  %v604_v15 = vadd.f32 %v603_v14, %v601_v12  ;;  %v712_v11 = vrot.slane %v1261_v48, %v1507_v19 }
 0x192   :  { %605 = vadd.xlane.f32.xlu1 %v604_v15 }
 0x21d   :  { %v596_v17 = vpop.xlane.xlu0 %595 }
 0x21e   :  { %v597_v4 = vmul.f32 0.001953125, %v596_v17 }
 0x21f   :  { %v606_v20 = vpop.xlane.xlu1 %605 }
 0x220   :  { %v608_v21 = vmul.f32 %v597_v4, %v597_v4  ;;  %v607_v22 = vmul.f32 0.001953125, %v606_v20 }
 0x222   :  { %v609_v23 = vsub.f32 %v607_v22, %v608_v21 }
 0x224   :  { %v610_v24 = vadd.f32 1e-05, %v609_v23 }
 0x226   :  { %1352 = vrsqrt.f32 %v610_v24 }
 0x230   :  { %v1353_v27 = vpop.eup %1352 }
 0x231   :  { %v612_v28 = vmul.f32 %v1353_v27, %v1648_v26  ;;  %v1263_v27 = vld [vmem:[%s1889_s1 + $0x3] ss:$8 sm:$0xf] }
 0x233   :  { %621 = vperm.xlu1 %1348, %v612_v28   ;;  %v613_v29 = vmul.f32 %v612_v28, %v597_v4 }
 0x235   :  { %615 = vrot.lane.b32.xlu0 %v613_v29, %s1363_s29 }
 0x2a7   :  { %v616_v30 = vpop.permute.xlu0 %615 }
 0x2a8   :  { %v618_v31 = vsub.f32 %v1648_v26, %v616_v30 }
 0x2aa   :  { %630 = vperm.xlu0 %1349, %v618_v31  }
 0x2b2   :  { %v622_v32 = vpop.permute.xlu1 %621 }
 0x2b3   :  { %v624_v33 = vmul.f32 %v622_v32, %v515_v2  ;;  %v625_v35 = vmul.f32 %v622_v32, %v517_v60  ;;  %v627_v36 = vmul.f32 %v622_v32, %v588_v6  ;;  %v626_v41 = vmul.f32 %v622_v32, %v586_v61 }
 0x2b4   :  { %v746_v32 = vrot.slane %v1262_v25, %v1491_v8 }
 0x329   :  { %v631_v34 = vpop.permute.xlu0 %630 }
 0x32a   :  { %v633_v37 = vadd.f32 %v631_v34, %v624_v33  ;;  %v634_v38 = vadd.f32 %v631_v34, %v625_v35  ;;  %v636_v39 = vadd.f32 %v631_v34, %v627_v36  ;;  %v635_v42 = vadd.f32 %v631_v34, %v626_v41 }
 0x32b   :  { %v788_v33 = vrot.slane %v1263_v27, %v1491_v8 }
 0x32c   :  { %v1653_v40 = vmax.f32 %v633_v37, 0.0  ;;  %v1659_v43 = vmax.f32 %v634_v38, 0.0  ;;  %v1661_v44 = vmax.f32 %v636_v39, 0.0  ;;  %v1667_v45 = vmax.f32 %v635_v42, 0.0 }
 0x32d   :  { %v742_v38 = vrot.slane %v1262_v25, %v1499_v13  ;;  %v784_v42 = vrot.slane %v1263_v27, %v1499_v13 }
 0x32e   :  { %683 = vrot.lane.b32.xlu0 %v1653_v40, %s1360_s20  ;;  %641 = vrot.lane.b32.xlu1 %v1653_v40, %s1361_s21 }
 0x332   :  { %647 = vrot.lane.b32.xlu0 %v1661_v44, %s1361_s21  ;;  %643 = vrot.lane.b32.xlu1 %v1659_v43, %s1361_s21 }
 0x336   :  { %645 = vrot.lane.b32.xlu0 %v1667_v45, %s1361_s21  ;;  %685 = vrot.lane.b32.xlu1 %v1659_v43, %s1360_s20 }
 0x33a   :  { %725 = vrot.lane.b32.xlu0 %v1653_v40, %s1362_s28  ;;  %689 = vrot.lane.b32.xlu1 %v1661_v44, %s1360_s20 }
 0x33e   :  { %767 = vrot.lane.b32.xlu0 %v1653_v40, %s1363_s29  ;;  %687 = vrot.lane.b32.xlu1 %v1667_v45, %s1360_s20 }
 0x342   :  { %731 = vrot.lane.b32.xlu0 %v1661_v44, %s1362_s28  ;;  %727 = vrot.lane.b32.xlu1 %v1659_v43, %s1362_s28 }
 0x346   :  { %729 = vrot.lane.b32.xlu0 %v1667_v45, %s1362_s28  ;;  %769 = vrot.lane.b32.xlu1 %v1659_v43, %s1363_s29 }
 0x34a   :  { %841 = vrot.lane.b32.xlu0 %v1659_v43, %s1364_s30  ;;  %773 = vrot.lane.b32.xlu1 %v1661_v44, %s1363_s29 }
 0x34e   :  { %839 = vrot.lane.b32.xlu0 %v1653_v40, %s1364_s30  ;;  %771 = vrot.lane.b32.xlu1 %v1667_v45, %s1363_s29 }
 0x352   :  { %883 = vrot.lane.b32.xlu0 %v1659_v43, %s1365_s6  ;;  %843 = vrot.lane.b32.xlu1 %v1667_v45, %s1364_s30 }
 0x356   :  { %925 = vrot.lane.b32.xlu0 %v1659_v43, %s1366_s7  ;;  %845 = vrot.lane.b32.xlu1 %v1661_v44, %s1364_s30 }
 0x35a   :  { %881 = vrot.lane.b32.xlu0 %v1653_v40, %s1365_s6  ;;  %885 = vrot.lane.b32.xlu1 %v1667_v45, %s1365_s6 }
 0x35e   :  { %887 = vrot.lane.b32.xlu0 %v1661_v44, %s1365_s6  ;;  %927 = vrot.lane.b32.xlu1 %v1667_v45, %s1366_s7 }
 0x362   :  { %967 = vrot.lane.b32.xlu0 %v1659_v43, %s1368_s8  ;;  %923 = vrot.lane.b32.xlu1 %v1653_v40, %s1366_s7 }
 0x366   :  { %965 = vrot.lane.b32.xlu0 %v1653_v40, %s1368_s8  ;;  %929 = vrot.lane.b32.xlu1 %v1661_v44, %s1366_s7 }
 0x36a   :  { %969 = vrot.lane.b32.xlu1 %v1667_v45, %s1368_s8 }
 0x36e   :  { %971 = vrot.lane.b32.xlu1 %v1661_v44, %s1368_s8 }
 0x3a0   :  { %v684_v46 = vpop.permute.xlu0 %683  ;;  %v642_v47 = vpop.permute.xlu1 %641 }
 0x3a4   :  { %v648_v49 = vpop.permute.xlu0 %647  ;;  %v644_v50 = vpop.permute.xlu1 %643 }
 0x3a5   :  { %v651_v53 = vsel %vm34_vm1, %v642_v47, %v644_v50  ;;  %v652_v2 = vsel %vm34_vm1, %v648_v49, %v642_v47 }
 0x3a6   :  { %v676_v58 = vmul.f32 %v662_v51, %v651_v53  ;;  %v675_v6 = vmul.f32 %v658_v57, %v652_v2  ;;  %v1265_v53 = vld [vmem:[%s1889_s1 + $0x5] ss:$8 sm:$0xf] }
 0x3a7   :  { %v856_v2 = vrot.slane %v1265_v53, %v1499_v13 }
 0x3a8   :  { %v646_v54 = vpop.permute.xlu0 %645  ;;  %v686_v55 = vpop.permute.xlu1 %685 }
 0x3a9   :  { %v693_v56 = vsel %vm77_vm0, %v684_v46, %v686_v55  ;;  %v649_v12 = vsel %vm34_vm1, %v646_v54, %v648_v49  ;;  %v650_v14 = vsel %vm34_vm1, %v644_v50, %v646_v54  ;;  %v750_v49 = vrot.slane %v1262_v25, %v1505_v18 }
 0x3aa   :  { %v718_v59 = vmul.f32 %v704_v52, %v693_v56  ;;  %v677_v21 = vmul.f32 %v666_v62, %v650_v14  ;;  %v678_v22 = vmul.f32 %v670_v63, %v649_v12  ;;  %v754_v50 = vrot.slane %v1262_v25, %v1507_v19  ;;  %v1264_v52 = vld [vmem:[%s1889_s1 + $0x4] ss:$8 sm:$0xf] }
 0x3ab   :  { %v792_v54 = vrot.slane %v1263_v27, %v1505_v18  ;;  %v814_v14 = vrot.slane %v1264_v52, %v1499_v13  ;;  %v864_v25 = vrot.slane %v1265_v53, %v1505_v18 }
 0x3ac   :  { %v726_v3 = vpop.permute.xlu0 %725  ;;  %v690_v60 = vpop.permute.xlu1 %689  ;;  %v1303_v61 = vpack.c.bf16 %v718_v59, %v676_v58  ;;  %v796_v58 = vrot.slane %v1263_v27, %v1507_v19  ;;  %v868_v27 = vrot.slane %v1265_v53, %v1507_v19 }
 0x3ad   :  { %v694_v5 = vsel %vm77_vm0, %v690_v60, %v684_v46 }
 0x3ae   :  { %v717_v9 = vmul.f32 %v700_v0, %v694_v5  ;;  %1304 = vmatprep.subr.bf16.mxu0 %v1303_v61  ;;  %v818_v61 = vrot.slane %v1264_v52, %v1491_v8 }
 0x3b0   :  { %v1305_v15 = vpack.c.bf16 %v717_v9, %v675_v6  ;;  %v768_v16 = vpop.permute.xlu0 %767  ;;  %v688_v17 = vpop.permute.xlu1 %687  ;;  %v860_v6 = vrot.slane %v1265_v53, %v1491_v8 }
 0x3b1   :  { %v691_v4 = vsel %vm77_vm0, %v688_v17, %v690_v60  ;;  %v692_v20 = vsel %vm77_vm0, %v686_v55, %v688_v17 }
 0x3b2   :  { %v719_v23 = vmul.f32 %v708_v10, %v692_v20  ;;  %v720_v24 = vmul.f32 %v712_v11, %v691_v4  ;;  %1306 = vmatpush1.bf16.msra.mxu0 %v1305_v15 }
 0x3b4   :  { %v1321_v28 = vpack.c.bf16 %v719_v23, %v677_v21  ;;  %v732_v29 = vpop.permute.xlu0 %731  ;;  %v728_v30 = vpop.permute.xlu1 %727  ;;  %v1319_v31 = vpack.c.bf16 %v720_v24, %v678_v22  ;;  %v822_v22 = vrot.slane %v1264_v52, %v1505_v18  ;;  %v826_v23 = vrot.slane %v1264_v52, %v1507_v19 }
 0x3b5   :  { %v735_v34 = vsel %vm121_vm2, %v726_v3, %v728_v30  ;;  %v736_v46 = vsel %vm121_vm2, %v732_v29, %v726_v3 }
 0x3b6   :  { %1320 = vmatprep.subr.bf16.mxu1 %v1319_v31  ;;  %v760_v39 = vmul.f32 %v746_v32, %v735_v34  ;;  %v759_v55 = vmul.f32 %v742_v38, %v736_v46 }
 0x3b7   :  { %1322 = vmatpush1.bf16.msra.mxu1 %v1321_v28  ;;  %v832_v28 = vmul.f32 %v818_v61, %v1659_v43  ;;  %v834_v43 = vmul.f32 %v826_v23, %v1661_v44 }
 0x3b8   :  { %v730_v35 = vpop.permute.xlu0 %729  ;;  %v770_v36 = vpop.permute.xlu1 %769 }
 0x3b9   :  { %v777_v37 = vsel %vm165_vm3, %v768_v16, %v770_v36  ;;  %v734_v56 = vsel %vm121_vm2, %v728_v30, %v730_v35  ;;  %v733_v59 = vsel %vm121_vm2, %v730_v35, %v732_v29  ;;  %v831_v29 = vmul.f32 %v814_v14, %v1653_v40  ;;  %v1266_v40 = vld [vmem:[%s1889_s1 + $0x6] ss:$8 sm:$0xf] }
 0x3ba   :  { %v802_v41 = vmul.f32 %v788_v33, %v777_v37  ;;  %v761_v62 = vmul.f32 %v750_v49, %v734_v56  ;;  %v762_v9 = vmul.f32 %v754_v50, %v733_v59  ;;  %v906_v59 = vrot.slane %v1266_v40, %v1505_v18 }
 0x3bc   :  { %v842_v47 = vpop.permute.xlu0 %841  ;;  %v774_v1 = vpop.permute.xlu1 %773  ;;  %v1307_v48 = vpack.c.bf16 %v802_v41, %v760_v39  ;;  %v1267_v39 = vld [vmem:[%s1889_s1 + $0x7] ss:$8 sm:$0xf] }
 0x3bd   :  { %v778_v51 = vsel %vm165_vm3, %v774_v1, %v768_v16  ;;  %v948_v61 = vrot.slane %v1267_v39, %v1505_v18 }
 0x3be   :  { %v801_v57 = vmul.f32 %v784_v42, %v778_v51  ;;  %1308 = vmatprep.subr.bf16.mxu0 %v1307_v48  ;;  %v898_v51 = vrot.slane %v1266_v40, %v1499_v13 }
 0x3c0   :  { %v1309_v0 = vpack.c.bf16 %v801_v57, %v759_v55  ;;  %v840_v3 = vpop.permute.xlu0 %839  ;;  %v772_v60 = vpop.permute.xlu1 %771 }
 0x3c1   :  { %v775_v63 = vsel %vm165_vm3, %v772_v60, %v774_v1  ;;  %v776_v5 = vsel %vm165_vm3, %v770_v36, %v772_v60  ;;  %v849_v10 = vsel %vm240_vm4, %v840_v3, %v842_v47  ;;  %v833_v36 = vmul.f32 %v822_v22, %v1667_v45 }
 0x3c2   :  { %v803_v11 = vmul.f32 %v792_v54, %v776_v5  ;;  %v804_v12 = vmul.f32 %v796_v58, %v775_v63  ;;  %1310 = vmatpush1.bf16.msra.mxu0 %v1309_v0  ;;  %v873_v20 = vmul.f32 %v856_v2, %v849_v10  ;;  %v902_v45 = vrot.slane %v1266_v40, %v1491_v8 }
 0x3c3   :  { %v944_v1 = vrot.slane %v1267_v39, %v1491_v8  ;;  %v940_v54 = vrot.slane %v1267_v39, %v1499_v13  ;;  %v910_v0 = vrot.slane %v1266_v40, %v1507_v19 }
 0x3c4   :  { %v1325_v15 = vpack.c.bf16 %v803_v11, %v761_v62  ;;  %v884_v16 = vpop.permute.xlu0 %883  ;;  %v844_v17 = vpop.permute.xlu1 %843  ;;  %v1323_v4 = vpack.c.bf16 %v804_v12, %v762_v9  ;;  %v1313_v33 = vpack.c.bf16 %v873_v20, %v831_v29  ;;  %v952_v62 = vrot.slane %v1267_v39, %v1507_v19  ;;  %v1268_v9 = vld [vmem:[%s1889_s1 + $0x20] ss:$8 sm:$0xf] }
 0x3c5   :  { %v848_v21 = vsel %vm240_vm4, %v842_v47, %v844_v17  ;;  %v994_v29 = vrot.slane %v1268_v9, %v1507_v19 }
 0x3c6   :  { %v874_v24 = vmul.f32 %v860_v6, %v848_v21  ;;  %1324 = vmatprep.subr.bf16.mxu1 %v1323_v4  ;;  %v982_v21 = vrot.slane %v1268_v9, %v1499_v13  ;;  %v1007_v13 = vld [vmem:[%s1892_s3] sm:$0xff] }
 0x3c7   :  { %1326 = vmatpush1.bf16.msra.mxu1 %v1325_v15  ;;  %v986_v15 = vrot.slane %v1268_v9, %v1491_v8  ;;  %v990_v8 = vrot.slane %v1268_v9, %v1505_v18 }
 0x3c8   :  { %v926_v30 = vpop.permute.xlu0 %925  ;;  %v846_v31 = vpop.permute.xlu1 %845  ;;  %v1311_v32 = vpack.c.bf16 %v874_v24, %v832_v28 }
 0x3c9   :  { %v847_v34 = vsel %vm240_vm4, %v844_v17, %v846_v31  ;;  %v850_v35 = vsel %vm240_vm4, %v846_v31, %v840_v3 }
 0x3ca   :  { %v875_v37 = vmul.f32 %v864_v25, %v847_v34  ;;  %v876_v38 = vmul.f32 %v868_v27, %v850_v35  ;;  %1312 = vmatprep.subr.bf16.mxu0 %v1311_v32 }
 0x3cb   :  { %1314 = vmatpush1.bf16.msra.mxu0 %v1313_v33 }
 0x3cc   :  { %v1329_v41 = vpack.c.bf16 %v875_v37, %v833_v36  ;;  %v882_v42 = vpop.permute.xlu0 %881  ;;  %v886_v46 = vpop.permute.xlu1 %885  ;;  %v1327_v47 = vpack.c.bf16 %v876_v38, %v834_v43 }
 0x3cd   :  { %v890_v44 = vsel %vm284_vm5, %v884_v16, %v886_v46  ;;  %v891_v55 = vsel %vm284_vm5, %v882_v42, %v884_v16 }
 0x3ce   :  { %1328 = vmatprep.subr.bf16.mxu1 %v1327_v47  ;;  %v916_v52 = vmul.f32 %v902_v45, %v890_v44  ;;  %v915_v3 = vmul.f32 %v898_v51, %v891_v55 }
 0x3cf   :  { %1330 = vmatpush1.bf16.msra.mxu1 %v1329_v41 }
 0x3d0   :  { %v888_v48 = vpop.permute.xlu0 %887  ;;  %v928_v49 = vpop.permute.xlu1 %927 }
 0x3d1   :  { %v932_v50 = vsel %vm328_vm6, %v926_v30, %v928_v49  ;;  %v889_v63 = vsel %vm284_vm5, %v886_v46, %v888_v48  ;;  %v892_v5 = vsel %vm284_vm5, %v888_v48, %v882_v42 }
 0x3d2   :  { %v958_v53 = vmul.f32 %v944_v1, %v932_v50  ;;  %v917_v16 = vmul.f32 %v906_v59, %v889_v63  ;;  %v918_v17 = vmul.f32 %v910_v0, %v892_v5  ;;  %v1371_v1 = vmov 2  }
 0x3d3   :  { %1350 = vset.pattern.permute.xlu1 %v1371_v1 }
 0x3d4   :  { %v968_v56 = vpop.permute.xlu0 %967  ;;  %v924_v57 = vpop.permute.xlu1 %923  ;;  %v1315_v58 = vpack.c.bf16 %v958_v53, %v916_v52 }
 0x3d5   :  { %v933_v2 = vsel %vm328_vm6, %v924_v57, %v926_v30 }
 0x3d6   :  { %v957_v60 = vmul.f32 %v940_v54, %v933_v2  ;;  %1316 = vmatprep.subr.bf16.mxu0 %v1315_v58  ;;  %v1372_v54 = vmov 3  }
 0x3d7   :  { %1351 = vset.pattern.permute.xlu0 %v1372_v54 }
 0x3d8   :  { %v1317_v6 = vpack.c.bf16 %v957_v60, %v915_v3  ;;  %v930_v10 = vpop.permute.xlu1 %929  ;;  %v966_v11 = vpop.permute.xlu0 %965 }
 0x3d9   :  { %v931_v12 = vsel %vm328_vm6, %v928_v49, %v930_v10  ;;  %v934_v14 = vsel %vm328_vm6, %v930_v10, %v924_v57  ;;  %v975_v22 = vsel %vm372_vm7, %v966_v11, %v968_v56  ;;  %v1356_v10 = vld [vmem:[%s1888_s0] sm:$0xff] }
 0x3da   :  { %v959_v4 = vmul.f32 %v948_v61, %v931_v12  ;;  %v960_v20 = vmul.f32 %v952_v62, %v934_v14  ;;  %1318 = vmatpush1.bf16.msra.mxu0 %v1317_v6  ;;  %v999_v30 = vmul.f32 %v982_v21, %v975_v22  ;;  %v1358_v14 = vld [vmem:[%s1888_s0 + $0x10] sm:$0xff] }
 0x3dc   :  { %v1333_v23 = vpack.c.bf16 %v959_v4, %v917_v16  ;;  %v970_v24 = vpop.permute.xlu1 %969  ;;  %v1331_v25 = vpack.c.bf16 %v960_v20, %v918_v17  ;;  %v1359_v16 = vld [vmem:[%s1888_s0 + $0x18] sm:$0xff] }
 0x3dd   :  { %v974_v27 = vsel %vm372_vm7, %v968_v56, %v970_v24 }
 0x3de   :  { %v1000_v28 = vmul.f32 %v986_v15, %v974_v27  ;;  %1332 = vmatprep.subr.bf16.mxu1 %v1331_v25 }
 0x3df   :  { %1334 = vmatpush1.bf16.msra.mxu1 %v1333_v23 }
 0x3e0   :  { %v972_v31 = vpop.permute.xlu1 %971  ;;  %1063 = vmatprep.subr.mxu0 %v1000_v28 }
 0x3e1   :  { %v973_v32 = vsel %vm372_vm7, %v970_v24, %v972_v31  ;;  %v976_v33 = vsel %vm372_vm7, %v972_v31, %v966_v11  ;;  %1064 = vmatpush1.msra.mxu0 %v999_v30 }
 0x3e2   :  { %v1001_v34 = vmul.f32 %v990_v8, %v973_v32  ;;  %v1002_v35 = vmul.f32 %v994_v29, %v976_v33  ;;  %1269 = vmatmul.mubr.msk.f32.vlgmr.msra.gmra.mrb[2].mxu0 %vm445_vm8, %v1007_v13 }
 0x3e4   :  { %1134 = vmatprep.subr.mxu1 %v1002_v35 }
 0x3e5   :  { %1135 = vmatpush1.msra.mxu1 %v1001_v34 }
 0x3e6   :  { %1270 = vmatmul.mubr.msk.f32.vlgmr.msra.gmra.mrb[2].mxu1 %vm445_vm8, %v1007_v13 }
 0x4b5   :  { %v1113_v18 = vpop.f32.mrb[2].mxu0 }
 0x4b6   :  { %v1196_v19 = vmul.f32 %v1113_v18, %v1113_v18  ;;  %v1115_v36 = vpop.f32.mrb[3].mxu0 }
 0x4b7   :  { %v1190_v37 = vadd.f32 %v1115_v36, %v1113_v18  ;;  %v1197_v38 = vmul.f32 %v1115_v36, %v1115_v36 }
 0x4b9   :  { %v1200_v43 = vadd.f32 %v1197_v38, %v1196_v19  ;;  %v1184_v40 = vpop.f32.mrb[2].mxu1 }
 0x4ba   :  { %v1198_v39 = vmul.f32 %v1184_v40, %v1184_v40  ;;  %v1186_v41 = vpop.f32.mrb[3].mxu1  ;;  %v1191_v7 = vadd.f32 %v1190_v37, %v1184_v40 }
 0x4bb   :  { %v1199_v42 = vmul.f32 %v1186_v41, %v1186_v41 }
 0x4bc   :  { %v1192_v46 = vadd.f32 %v1191_v7, %v1186_v41  ;;  %v1201_v47 = vadd.f32 %v1200_v43, %v1198_v39 }
 0x4be   :  { %1193 = vadd.xlane.f32.xlu0 %v1192_v46  ;;  %v1202_v45 = vadd.f32 %v1201_v47, %v1199_v42 }
 0x4c0   :  { %1203 = vadd.xlane.f32.xlu1 %v1202_v45 }
 0x54b   :  { %v1194_v44 = vpop.xlane.xlu0 %1193 }
 0x54c   :  { %v1195_v48 = vmul.f32 0.001953125, %v1194_v44 }
 0x54d   :  { %v1204_v49 = vpop.xlane.xlu1 %1203 }
 0x54e   :  { %v1206_v50 = vmul.f32 %v1195_v48, %v1195_v48  ;;  %v1205_v51 = vmul.f32 0.001953125, %v1204_v49 }
 0x550   :  { %v1207_v52 = vsub.f32 %v1205_v51, %v1206_v50 }
 0x552   :  { %v1208_v53 = vadd.f32 1e-05, %v1207_v52 }
 0x554   :  { %1354 = vrsqrt.f32 %v1208_v53 }
 0x55e   :  { %v1355_v55 = vpop.eup %1354 }
 0x55f   :  { %v1210_v56 = vmul.f32 %v1355_v55, %v1648_v26 }
 0x561   :  { %1219 = vperm.xlu1 %1350, %v1210_v56   ;;  %v1211_v57 = vmul.f32 %v1210_v56, %v1195_v48 }
 0x563   :  { %1213 = vrot.lane.b32.xlu0 %v1211_v57, %s1363_s29 }
 0x5d5   :  { %v1214_v58 = vpop.permute.xlu0 %1213 }
 0x5d6   :  { %v1216_v59 = vsub.f32 %v1648_v26, %v1214_v58  ;;  %v1357_v26 = vld [vmem:[%s1888_s0 + $0x8] sm:$0xff] }
 0x5d8   :  { %1228 = vperm.xlu0 %1351, %v1216_v59  }
 0x5e0   :  { %v1220_v0 = vpop.permute.xlu1 %1219 }
 0x5e1   :  { %v1222_v2 = vmul.f32 %v1220_v0, %v1113_v18  ;;  %v1223_v3 = vmul.f32 %v1220_v0, %v1115_v36  ;;  %v1224_v60 = vmul.f32 %v1220_v0, %v1184_v40  ;;  %v1225_v61 = vmul.f32 %v1220_v0, %v1186_v41 }
 0x657   :  { %v1229_v62 = vpop.permute.xlu0 %1228 }
 0x658   :  { %v1231_v63 = vadd.f32 %v1229_v62, %v1222_v2  ;;  %v1232_v5 = vadd.f32 %v1229_v62, %v1223_v3  ;;  %v1233_v6 = vadd.f32 %v1229_v62, %v1224_v60  ;;  %v1234_v9 = vadd.f32 %v1229_v62, %v1225_v61 }
 0x65a   :  { %v1235_v11 = vadd.f32 %v1356_v10, %v1231_v63  ;;  %v1236_v12 = vadd.f32 %v1357_v26, %v1232_v5  ;;  %v1237_v15 = vadd.f32 %v1358_v14, %v1233_v6  ;;  %v1238_v17 = vadd.f32 %v1359_v16, %v1234_v9 }
 0x65c   :  { %v1239_v4 = vmax.f32 %v1235_v11, 0.0  ;;  %v1240_v20 = vmax.f32 %v1236_v12, 0.0  ;;  %v1241_v21 = vmax.f32 %v1237_v15, 0.0  ;;  %v1242_v22 = vmax.f32 %v1238_v17, 0.0 }
 0x65e   :  { %1243 = vst [vmem:[%s1893_s5] sm:$0xff] %v1239_v4  ;;  %1244 = vst [vmem:[%s1893_s5 + $0x8] sm:$0xff] %v1240_v20 }
 0x65f   :  { %1245 = vst [vmem:[%s1893_s5 + $0x10] sm:$0xff] %v1241_v21  ;;  %1246 = vst [vmem:[%s1893_s5 + $0x18] sm:$0xff] %v1242_v22 }

</bundles_post_ra>
